<compile_context>
chip_gen: v7x
topology: tpu7x:2x2x1
jax: 0.10.0
libtpu: 0.0.40
codegen_flags: <defaults>
</compile_context>

<pallas_src>
import functools

import jax
import jax.numpy as jnp
from jax.experimental import pallas as pl
from jax.experimental.pallas import tpu as pltpu


_LN2 = 0.6931471805599453
# Taylor coefficients of the even part of softplus, log(2*cosh(x/2)), in u = x^2.
_C2 = 1.0 / 8.0
_C4 = -1.0 / 192.0
_C6 = 1.0 / 2880.0
_C8 = -17.0 / 645120.0


def _round_up(x, m):
    return ((x + m - 1) // m) * m


def _pick_tile(n, max_tile, mult):
    """Largest tile <= max_tile (multiple of `mult`) that minimizes padding."""
    full = _round_up(n, mult)
    if full <= max_tile:
        return full
    blocks = -(-n // max_tile)            # ceil(n / max_tile)
    return _round_up(-(-n // blocks), mult)


def _recon_loss_kernel(h_r_ref, h_c_ref, tgt_ref, out_ref):
    """One (tm, tn) tile of one graph's N x N reconstruction matrix."""
    h_r = h_r_ref[...]                       # (tm, D) bf16 row block
    h_c = h_c_ref[...]                       # (tn, D) bf16 col block, pre-scaled 0.5
    # 0.5 * h_r @ h_c_orig.T on the MXU, f32 accumulation, no in-kernel transpose.
    s_half = jax.lax.dot_general(
        h_r, h_c, (((1,), (1,)), ((), ())),
        preferred_element_type=jnp.float32)  # (tm, tn) = s / 2

    t = jnp.tanh(s_half)                     # = 2*sigmoid(s) - 1, in (-1, 1)  (EUP)
    is_pos = tgt_ref[...] != 0               # diagonal + padding already baked in
    x = jnp.where(is_pos, -t, t)             # nll = softplus(x), |x| <= 1

    # softplus(x) = x/2 + log(2*cosh(x/2)); even part as Horner poly in u = x^2.
    u = x * x
    nll = 0.5 * x + (_LN2 + u * (_C2 + u * (_C4 + u * (_C6 + u * _C8))))

    total_nll = jnp.sum(nll)                          # all cells (incl. padding)
    pos_nll = jnp.sum(jnp.where(is_pos, nll, 0.0))    # target == 1 cells only

    # Lane-dense (8, 128) partials block: total at (0, 0), positive-sum at (0, 1).
    lane = jax.lax.broadcasted_iota(jnp.int32, (8, 128), 1)
    sub = jax.lax.broadcasted_iota(jnp.int32, (8, 128), 0)
    r0 = sub == 0
    out_ref[...] = jnp.where(r0 & (lane == 0), total_nll,
                   jnp.where(r0 & (lane == 1), pos_nll, 0.0))


@functools.partial(jax.jit, static_argnames=("tm", "tn"))
def _construct_loss_batched(h_rows, h_cols_half, target, n_nodes, tm, tn):
    """All graphs in one pallas_call.

    h_rows:      (G, n_r, D) bf16, zero-padded node features.
    h_cols_half: (G, n_c, D) bf16, zero-padded node features scaled by 0.5.
    target:      (G, n_r, n_c) int8, (adj | diag) with zeros in padded region.
    n_nodes:     (G,) int32, true node counts.
    """
    g, n_r, d = h_rows.shape
    _, n_c, _ = h_cols_half.shape
    grid_r = n_r // tm
    grid_c = n_c // tn

    partials = pl.pallas_call(
        _recon_loss_kernel,
        out_shape=jax.ShapeDtypeStruct((g, grid_r * 8, grid_c * 128), jnp.float32),
        grid_spec=pltpu.PrefetchScalarGridSpec(
            num_scalar_prefetch=0,
            grid=(g, grid_r, grid_c),
            in_specs=[
                pl.BlockSpec((None, tm, d), lambda b, i, j: (b, i, 0)),   # rows of h
                pl.BlockSpec((None, tn, d), lambda b, i, j: (b, j, 0)),   # cols (x0.5)
                pl.BlockSpec((None, tm, tn), lambda b, i, j: (b, i, j)),  # target tile
            ],
            out_specs=pl.BlockSpec((None, 8, 128), lambda b, i, j: (b, i, j)),
        ),
        compiler_params=pltpu.CompilerParams(
            # Every grid cell writes an independent output block -> fully parallel
            # (megacore on v7x gets work even for small graphs via the G axis).
            dimension_semantics=("parallel", "parallel", "parallel"),
            # Explicit scoped-VMEM limit: above v5e's 16 MiB default, still well
            # within v7x's 64 MiB physical VMEM at 512x512 tiles.
            vmem_limit_bytes=64 * 1024 * 1024),
    )(h_rows, h_cols_half, target)

    # Tiny wrapper-side reduction of per-block partials.
    sums = partials.reshape(g, grid_r, 8, grid_c, 128).sum(axis=(1, 3))  # (G, 8, 128)
    total_nll = sums[:, 0, 0]
    a1 = sums[:, 0, 1]                                 # sum of nll over target==1

    n_f = n_nodes.astype(jnp.float32)
    nsq = n_f * n_f
    # Padded cells have score exactly 0 and target 0, so each contributes exactly
    # the polynomial's constant term (= ln 2) to total_nll.  Correct analytically.
    npad = jnp.float32(n_r * n_c) - nsq
    a0 = (total_nll - npad * jnp.float32(_LN2)) - a1   # sum of nll over target==0

    c1 = jnp.sum(target.astype(jnp.float32), axis=(1, 2))   # = n + nnz(adj) per graph
    c0 = nsq - c1
    pos_w = c0 / c1                                    # (N*N - sum(target))/sum(target)
    # PyTorch weighted 'mean' cross-entropy: sum(w_y * nll) / sum(w_y)
    loss_g = (a0 + pos_w * a1) / (c0 + pos_w * c1)
    return jnp.mean(loss_g)


def construct_loss(graphs, max_tile=512):
    """graphs: list of (h, adj) with h: (N, D) float, adj: (N, N) 0/1, zero diag.

    Returns a device scalar (mean loss over graphs); single sync at the end.
    Assumes (like the PyTorch module) that adj is 0/1 with a zero diagonal.
    """
    n_list = [int(h.shape[0]) for h, _ in graphs]
    d = int(graphs[0][0].shape[1])
    n_max = max(n_list)

    tm = _pick_tile(n_max, max_tile, 32)      # int8 sublane packing for target rows
    tn = _pick_tile(n_max, max_tile, 128)     # lane density for target cols
    n_r = _round_up(n_max, tm)
    n_c = _round_up(n_max, tn)

    row_ids = jnp.arange(n_r, dtype=jnp.int32)[:, None]
    col_ids = jnp.arange(n_c, dtype=jnp.int32)[None, :]

    h_rows, h_cols, targets = [], [], []
    for (h, adj), n in zip(graphs, n_list):
        h32 = jnp.asarray(h, jnp.float32)
        h_rows.append(jnp.zeros((n_r, d), jnp.bfloat16).at[:n].set(
            h32.astype(jnp.bfloat16)))
        # Fold the 0.5 of tanh(s/2) into the column copy (exact power-of-two scale).
        h_cols.append(jnp.zeros((n_c, d), jnp.bfloat16).at[:n].set(
            (h32 * 0.5).astype(jnp.bfloat16)))
        adj_pad = jnp.zeros((n_r, n_c), jnp.bool_).at[:n, :n].set(
            jnp.asarray(adj) != 0)
        diag = (row_ids == col_ids) & (row_ids < n) & (col_ids < n)
        targets.append((adj_pad | diag).astype(jnp.int8))

    return _construct_loss_batched(
        jnp.stack(h_rows), jnp.stack(h_cols), jnp.stack(targets),
        jnp.asarray(n_list, jnp.int32), tm, tn)


def _reference_loss_single(h, adj):
    """Pure-JAX f32 reference of the PyTorch forward (for verification)."""
    n = h.shape[0]
    z = jax.nn.sigmoid(h.astype(jnp.float32) @ h.astype(jnp.float32).T)
    logits = jnp.stack([1.0 - z.reshape(-1), z.reshape(-1)], axis=1)   # (N*N, 2)
    target = (jnp.eye(n, dtype=jnp.float32) + adj).reshape(-1).astype(jnp.int32)
    s = jnp.sum(target).astype(jnp.float32)
    pos_w = (n * n - s) / s
    weight = jnp.stack([jnp.float32(1.0), pos_w])
    logp = jax.nn.log_softmax(logits, axis=-1)
    nll = -jnp.take_along_axis(logp, target[:, None], axis=1)[:, 0]
    w = weight[target]
    return jnp.sum(w * nll) / jnp.sum(w)


if __name__ == "__main__":
    key = jax.random.PRNGKey(0)
    num_graphs = 2
    N, D = 16, 32     # nodes per graph, hidden size

    graphs = []
    for _ in range(num_graphs):
        key, kh, ka = jax.random.split(key, 3)
        h = jax.random.normal(kh, (N, D), dtype=jnp.float32) * 0.5
        # Random symmetric 0/1 adjacency with zero diagonal (no self loops).
        upper = (jax.random.uniform(ka, (N, N)) < 0.2).astype(jnp.float32)
        adj = jnp.triu(upper, k=1)
        adj = adj + adj.T
        graphs.append((h, adj))

    # Pallas kernel path: one batched pallas_call, single device sync at the end.
    loss = construct_loss(graphs)
    loss = jax.block_until_ready(loss)

    # Verify against the pure-JAX f32 reference of the PyTorch semantics.
    # Tolerance loosened vs strict f32 because the kernel uses a bf16 MXU matmul.
    ref = jnp.mean(jnp.stack([_reference_loss_single(h, adj) for h, adj in graphs]))
    assert abs(float(loss) - float(ref)) < 2e-2, \
        f"mismatch: kernel={float(loss)} ref={float(ref)}"

    # TODO(synk): for very large D, additionally tile the contraction (K) axis.
    print("KERNEL_OK")
</pallas_src>

<mosaic_0001>
module attributes {stable_mosaic.version = 11 : i64} {
  func.func @_recon_loss_kernel(%arg0: i32, %arg1: i32, %arg2: i32, %arg3: memref<1x32x32xbf16, #tpu.memory_space<vmem>>, %arg4: memref<1x128x32xbf16, #tpu.memory_space<vmem>>, %arg5: memref<1x32x128xi8, #tpu.memory_space<vmem>>, %arg6: memref<1x8x128xf32, #tpu.memory_space<vmem>>) attributes {dimension_semantics = [#tpu.dimension_semantics<parallel>, #tpu.dimension_semantics<parallel>, #tpu.dimension_semantics<parallel>], iteration_bounds = array<i64: 2, 1, 1>, scalar_prefetch = 0 : i64, scratch_operands = 0 : i64, tpu.core_type = #tpu.core_type<tc>, window_params = [{transform_indices = @transform_0, window_bounds = array<i64: 1, 32, 32>}, {transform_indices = @transform_1, window_bounds = array<i64: 1, 128, 32>}, {transform_indices = @transform_2, window_bounds = array<i64: 1, 32, 128>}, {transform_indices = @transform_3, window_bounds = array<i64: 1, 8, 128>}]} {
    %c0 = arith.constant 0 : index
    %c0_0 = arith.constant 0 : index
    %c0_1 = arith.constant 0 : index
    %0 = vector.load %arg3[%c0, %c0_0, %c0_1] : memref<1x32x32xbf16, #tpu.memory_space<vmem>>, vector<1x32x32xbf16>
    %1 = vector.shape_cast %0 : vector<1x32x32xbf16> to vector<32x32xbf16>
    %c0_2 = arith.constant 0 : index
    %c0_3 = arith.constant 0 : index
    %c0_4 = arith.constant 0 : index
    %2 = vector.load %arg4[%c0_2, %c0_3, %c0_4] : memref<1x128x32xbf16, #tpu.memory_space<vmem>>, vector<1x128x32xbf16>
    %3 = vector.shape_cast %2 : vector<1x128x32xbf16> to vector<128x32xbf16>
    %cst = arith.constant dense<0.000000e+00> : vector<32x128xf32>
    %4 = tpu.matmul %1, %3, %cst {dimension_numbers = #tpu.dot_dimension_numbers<[1], [1], [0], [0], [0, 0, 1, 0], [], []>} : vector<32x32xbf16>, vector<128x32xbf16>, vector<32x128xf32> -> vector<32x128xf32>
    %5 = math.tanh %4 : vector<32x128xf32>
    %c0_5 = arith.constant 0 : index
    %c0_6 = arith.constant 0 : index
    %c0_7 = arith.constant 0 : index
    %6 = vector.load %arg5[%c0_5, %c0_6, %c0_7] : memref<1x32x128xi8, #tpu.memory_space<vmem>>, vector<1x32x128xi8>
    %7 = vector.shape_cast %6 : vector<1x32x128xi8> to vector<32x128xi8>
    %c0_i8 = arith.constant 0 : i8
    %8 = vector.broadcast %c0_i8 : i8 to vector<32x128xi8>
    %9 = arith.cmpi ne, %7, %8 : vector<32x128xi8>
    %cst_8 = arith.constant 0.000000e+00 : f32
    %10 = vector.broadcast %cst_8 : f32 to vector<32x128xf32>
    %11 = arith.subf %10, %5 : vector<32x128xf32>
    %12 = arith.select %9, %11, %5 : vector<32x128xi1>, vector<32x128xf32>
    %13 = arith.mulf %12, %12 : vector<32x128xf32>
    %cst_9 = arith.constant 5.000000e-01 : f32
    %14 = vector.broadcast %cst_9 : f32 to vector<32x128xf32>
    %15 = arith.mulf %14, %12 : vector<32x128xf32>
    %cst_10 = arith.constant -2.63516868E-5 : f32
    %16 = vector.broadcast %cst_10 : f32 to vector<32x128xf32>
    %17 = arith.mulf %13, %16 : vector<32x128xf32>
    %cst_11 = arith.constant 3.47222231E-4 : f32
    %18 = vector.broadcast %cst_11 : f32 to vector<32x128xf32>
    %19 = arith.addf %18, %17 : vector<32x128xf32>
    %20 = arith.mulf %13, %19 : vector<32x128xf32>
    %cst_12 = arith.constant -0.00520833349 : f32
    %21 = vector.broadcast %cst_12 : f32 to vector<32x128xf32>
    %22 = arith.addf %21, %20 : vector<32x128xf32>
    %23 = arith.mulf %13, %22 : vector<32x128xf32>
    %cst_13 = arith.constant 1.250000e-01 : f32
    %24 = vector.broadcast %cst_13 : f32 to vector<32x128xf32>
    %25 = arith.addf %24, %23 : vector<32x128xf32>
    %26 = arith.mulf %13, %25 : vector<32x128xf32>
    %cst_14 = arith.constant 0.693147182 : f32
    %27 = vector.broadcast %cst_14 : f32 to vector<32x128xf32>
    %28 = arith.addf %27, %26 : vector<32x128xf32>
    %29 = arith.addf %15, %28 : vector<32x128xf32>
    %30 = vector.shape_cast %29 : vector<32x128xf32> to vector<1x32x128xf32>
    %cst_15 = arith.constant dense<0.000000e+00> : vector<1xf32>
    %31 = vector.multi_reduction <add>, %30, %cst_15 [1, 2] : vector<1x32x128xf32> to vector<1xf32>
    %32 = vector.shape_cast %31 : vector<1xf32> to vector<1x1x1xf32>
    %33 = vector.extract %32[0, 0, 0] : f32 from vector<1x1x1xf32>
    %cst_16 = arith.constant 0.000000e+00 : f32
    %34 = vector.broadcast %cst_16 : f32 to vector<32x128xf32>
    %35 = arith.select %9, %29, %34 : vector<32x128xi1>, vector<32x128xf32>
    %36 = vector.shape_cast %35 : vector<32x128xf32> to vector<1x32x128xf32>
    %cst_17 = arith.constant dense<0.000000e+00> : vector<1xf32>
    %37 = vector.multi_reduction <add>, %36, %cst_17 [1, 2] : vector<1x32x128xf32> to vector<1xf32>
    %38 = vector.shape_cast %37 : vector<1xf32> to vector<1x1x1xf32>
    %39 = vector.extract %38[0, 0, 0] : f32 from vector<1x1x1xf32>
    %40 = tpu.iota {dimensions = array<i32: 1>} : vector<8x128xi32>
    %41 = tpu.iota {dimensions = array<i32: 0>} : vector<8x128xi32>
    %c0_i32 = arith.constant 0 : i32
    %42 = vector.broadcast %c0_i32 : i32 to vector<8x128xi32>
    %43 = arith.cmpi eq, %41, %42 : vector<8x128xi32>
    %c0_i32_18 = arith.constant 0 : i32
    %44 = vector.broadcast %c0_i32_18 : i32 to vector<8x128xi32>
    %45 = arith.cmpi eq, %40, %44 : vector<8x128xi32>
    %46 = arith.andi %43, %45 : vector<8x128xi1>
    %c1_i32 = arith.constant 1 : i32
    %47 = vector.broadcast %c1_i32 : i32 to vector<8x128xi32>
    %48 = arith.cmpi eq, %40, %47 : vector<8x128xi32>
    %49 = arith.andi %43, %48 : vector<8x128xi1>
    %cst_19 = arith.constant 0.000000e+00 : f32
    %50 = vector.broadcast %39 : f32 to vector<8x128xf32>
    %51 = vector.broadcast %cst_19 : f32 to vector<8x128xf32>
    %52 = arith.select %49, %50, %51 : vector<8x128xi1>, vector<8x128xf32>
    %53 = vector.broadcast %33 : f32 to vector<8x128xf32>
    %54 = arith.select %46, %53, %52 : vector<8x128xi1>, vector<8x128xf32>
    %c0_20 = arith.constant 0 : index
    %c0_21 = arith.constant 0 : index
    %c0_22 = arith.constant 0 : index
    %55 = vector.load %arg6[%c0_20, %c0_21, %c0_22] : memref<1x8x128xf32, #tpu.memory_space<vmem>>, vector<1x8x128xf32>
    %56 = vector.shape_cast %55 : vector<1x8x128xf32> to vector<8x128xf32>
    %57 = vector.shape_cast %54 : vector<8x128xf32> to vector<1x8x128xf32>
    tpu.vector_store %arg6[%c0_20, %c0_21, %c0_22], %57 {strides = array<i32>} : memref<1x8x128xf32, #tpu.memory_space<vmem>>, vector<1x8x128xf32>,
    return
  }
  func.func @transform_0(%arg0: i32, %arg1: i32, %arg2: i32) -> (i32, i32, i32) {
    %c0_i32 = arith.constant 0 : i32
    %c0_i32_0 = arith.constant 0 : i32
    return %arg0, %arg1, %c0_i32 : i32, i32, i32
  }
  func.func @transform_1(%arg0: i32, %arg1: i32, %arg2: i32) -> (i32, i32, i32) {
    %c0_i32 = arith.constant 0 : i32
    %c0_i32_0 = arith.constant 0 : i32
    return %arg0, %arg2, %c0_i32 : i32, i32, i32
  }
  func.func @transform_2(%arg0: i32, %arg1: i32, %arg2: i32) -> (i32, i32, i32) {
    %c0_i32 = arith.constant 0 : i32
    return %arg0, %arg1, %arg2 : i32, i32, i32
  }
  func.func @transform_3(%arg0: i32, %arg1: i32, %arg2: i32) -> (i32, i32, i32) {
    %c0_i32 = arith.constant 0 : i32
    return %arg0, %arg1, %arg2 : i32, i32, i32
  }
}

</mosaic_0001>

<bundles_post_ra>
// kernel: _construct_loss_batched.1
= control target key start
LH: loop header
LB: loop body
LE: loop exit
PB: predicated region body
PF: predicated region fallthrough
CT: control target
= control target key end

     0   :  { %s1430_s0 = inlined_call_operand.hbm [shape: bf16[2,32,32], index: 0, kind: input, shape index: {}]   ;;  %s1431_s1 = inlined_call_operand.hbm [shape: bf16[2,128,32], index: 1, kind: input, shape index: {}]   ;;  %s1432_s2 = inlined_call_operand.hbm [shape: s8[2,32,128], index: 2, kind: input, shape index: {}]   ;;  %s1433_s3 = inlined_call_operand.hbm [shape: f32[2,8,128], index: 3, kind: output, shape index: {}]  }
   0x1   :  { %1444 = sst [smem:[#allocation17_spill]] %s1430_s0 }
   0x2   :  { %1445 = sst [smem:[#allocation18_spill]] %s1431_s1 }
   0x3   :  { %8 = vsyncpa [#allocation3], 0 }
   0x4   :  { %10 = vsyncpa [#allocation3 + $0x1], 0 }
   0x5   :  { %11 = vsyncpa [#allocation6], 0 }
   0x6   :  { %13 = vsyncpa [#allocation6 + $0x1], 0 }
   0x7   :  { %14 = vsyncpa [#allocation4], 0 }
   0x8   :  { %16 = vsyncpa [#allocation4 + $0x1], 0  ;;  %s1109_s12 = smov 0   ;;  %s1111_s13 = smov 0  }
   0x9   :  { %s1113_s14 = smov 0   ;;  %s1115_s15 = smov 0  }
   0xa   :  { %s1117_s16 = smov 0   ;;  %s1119_s17 = smov 0  }
   0xb LB: > { %1446 = sst [smem:[#allocation12_spill]] %s1068_s14  ;;  %s1140_s18 = sadd.s32 4294967295, %s1080_s17   ;;  %s1080_s17 = sphi %s1119_s17, %s22_s17   ;;  %s1076_s16 = sphi %s1117_s16, %s1484_s16   ;;  %s1072_s15 = sphi %s1115_s15, %s1483_s15   ;;  %s1068_s14 = sphi %s1113_s14, %s1479_s14   ;;  %s1064_s13 = sphi %s1111_s13, %s1482_s13   ;;  %s1060_s12 = sphi %s1109_s12, %s1481_s12  }
   0xc   : > { %1447 = sst [smem:[#allocation13_spill]] %s1080_s17  ;;  %s735_s19 = sadd.s32 4294967294, %s1080_s17  }
   0xd   : > { %s41_s20 = sadd.s32 1, %s1076_s16  ;;  %s50_s21 = sadd.s32 1, %s1068_s14 }
   0xe   : > { %p43_p0 = scmp.ge.s32.totalorder %s41_s20, 2  ;;  %p57_p1 = scmp.ne.s32.totalorder %s1068_s14, %s1064_s13 }
   0xf   : > { %p58_p2 = scmp.eq.s32.totalorder %s1080_s17, 0  ;;  %p63_p3 = scmp.ne.s32.totalorder %s1064_s13, %s1060_s12 }
  0x10   : > { %s1486_s20 = smov (%p43_p0, %s41_s20), 0  ;;  %p64_p5 = scmp.eq.s32.totalorder %s1140_s18, 0 }
  0x11   : > { %1448 = sst [smem:[#allocation14_spill]] %s1486_s20  ;;  %p1152_p4 = por %p58_p2, %p57_p1 }
  0x12   : > { %s45_s23 = ssub.s32 %s1076_s16, %s1486_s20  ;;  %p149_p6 = scmp.eq.s32.totalorder %s1140_s18, 1 }
  0x13   : > { %p48_p7 = scmp.eq.s32.totalorder %s45_s23, 0  ;;  %p1160_p8 = por %p64_p5, %p63_p3 }
  0x14   : > { %p1164_p9 = por %p149_p6, %p57_p1  ;;  %p155_p10 = scmp.eq.s32.totalorder %s735_s19, 1 }
  0x15   : > { %s1450_s24 = scalar_select %p1160_p8, 1, 0 }
  0x16   : > { %s1451_s25 = scalar_select %p1164_p9, 1, 0 }
  0x17   : > { %s1169_s26 = scalar_select %p48_p7, %s1068_s14, %s50_s21  }
  0x18   : > { %p1171_p11 = por %p155_p10, %p63_p3  ;;  %p833_p13 = scmp.lt.s32.totalorder %s1080_s17, 2 }
  0x19   : > { %1452 = sst [smem:[#allocation15_spill]] %s1169_s26  ;;  %s1178_s28 = sand.u32 1, %s1068_s14  }
  0x1a   : > { %s1453_s27 = scalar_select %p1171_p11, 1, 0 }
  0x1b   : > { %p1182_p0 = pnand %p833_p13, %p1152_p4  ;;  %s198_s30 = sand.u32 1, %s1080_s17  }
  0x1c   : > { %1454 = sst [smem:[#allocation16_spill]] %s1453_s27  ;;  %s741_s4 = sshll.u32 %s1178_s28, 6 }
  0x1d   : > { %s1455_s29 = scalar_select %p1182_p0, 1, 0 }
  0x1e   : > { %s768_s5 = sshll.u32 %s1076_s16, 10  ;;  %s202_s6 = scalar_lea.vmem [#allocation5], %s741_s4 }
  0x1f   : > { %s211_s7 = sshll.u32 %s202_s6, 4  ;;  %s1456_s1 = sld [smem:[#allocation18_spill]]  ;;  %s1194_s7 = int_to_ptr.vmem [resolvable:$true] %s211_s7 }
  0x20   : > { %s1196_s11 = scalar_lea.sflag [#allocation6], %s198_s30  ;;  %p1202_p2 = pneg %p1182_p0 }
  0x25   : > { %s1192_s10 = scalar_lea.hbm %s1456_s1, %s768_s5  ;;  %s909_s4 = scalar_lea.hbm %s1456_s1, 2048 }
  0x26   : > { %s904_s19 = scalar_lea.hbm %s1192_s10, 1024  ;;  %p910_p5 = scmp.lt.u32.totalorder %s1192_s10, %s1456_s1 }
  0x27   : > { %p905_p1 = scmp.ne.s32.totalorder %s1192_s10, %s904_s19  ;;  %p911_p6 = scmp.lt.u32.totalorder %s909_s4, %s904_s19 }
  0x28   : > { %p913_p10 = scmp.lt.u32.totalorder %s904_s19, %s1192_s10 }
  0x29   : > { %p907_p3 = pnand %p1202_p2, %p905_p1  ;;  %p912_p7 = por %p911_p6, %p910_p5 }
  0x2b   : > { %p908_p4 = pneg %p907_p3  ;;  %p914_p13 = por %p913_p10, %p912_p7 }
  0x2d   : > { %p915_p12 = pnand %p914_p13, %p908_p4 }
  0x2f   : > { %918 = shalt.err (!%p915_p12)
}
  0x30   : > { %s919_s30 = scalar_lea.vmem %s1194_s7, 1024  ;;  %s1082_s8 = smov [#allocation5]  }
  0x31   : > { %p920_p1 = scmp.ne.s32.totalorder %s1194_s7, %s919_s30  ;;  %s924_s9 = sshll.u32 %s1082_s8, 4  ;;  %s925_s9 = int_to_ptr.vmem [resolvable:$false] %s924_s9 }
  0x32   : > { %s926_s22 = scalar_lea.vmem %s925_s9, 2048  ;;  %p927_p9 = scmp.lt.s32.totalorder %s1194_s7, %s925_s9 }
  0x33   : > { %p922_p3 = pnand %p920_p1, %p1202_p2  ;;  %p928_p8 = scmp.lt.s32.totalorder %s926_s22, %s919_s30 }
  0x35   : > { %p923_p11 = pneg %p922_p3  ;;  %p929_p5 = por %p928_p8, %p927_p9 }
  0x37   : > { %p930_p6 = pnand %p929_p5, %p923_p11 }
  0x39   : > { %933 = shalt.err (!%p930_p6)
}
  0x3a   : > { %s1436_s19 = smov 64   ;;  %s1437_s23 = smov 4  }
  0x3b   : > { %825 = dma.hbm_to_vmem [thread:$0]  (!%p1182_p0), %s1192_s10, 1024, %s1194_s7, %s1196_s11, %s1436_s19, %s1436_s19, %s1437_s23  }
  0x3c   : > { %p746_p8 = scmp.ge.s32.totalorder %s1080_s17, 1  ;;  %p239_p9 = scmp.lt.s32.totalorder %s1080_s17, 3 }
  0x3d   : > { %s738_s5 = sshll.u32 %s1178_s28, 4  ;;  %s767_s6 = sshll.u32 %s1076_s16, 8 }
  0x3e   : > { %p1231_p11 = pnand %p746_p8, %p239_p9  ;;  %s1459_s0 = sld [smem:[#allocation17_spill]] }
  0x3f   : > { %s179_s22 = scalar_lea.vmem [#allocation2], %s738_s5  ;;  %s744_s7 = sshll.u32 %s1178_s28, 3 }
  0x40   : > { %s1458_s4 = scalar_select %p1231_p11, 1, 0 }
  0x41   : > { %s188_s1 = sshll.u32 %s179_s22, 4  ;;  %s176_s10 = scalar_lea.sflag [#allocation3], %s1178_s28  ;;  %s1243_s1 = int_to_ptr.vmem [resolvable:$true] %s188_s1 }
  0x44   : > { %s1240_s9 = scalar_lea.hbm %s1459_s0, %s767_s6  ;;  %s939_s6 = scalar_lea.hbm %s1459_s0, 512 }
  0x45   : > { %s934_s19 = scalar_lea.hbm %s1240_s9, 256  ;;  %p940_p10 = scmp.lt.u32.totalorder %s1240_s9, %s1459_s0 }
  0x46   : > { %p935_p12 = scmp.ne.s32.totalorder %s1240_s9, %s934_s19  ;;  %p941_p13 = scmp.lt.u32.totalorder %s939_s6, %s934_s19 }
  0x47   : > { %p943_p3 = scmp.lt.u32.totalorder %s934_s19, %s1240_s9 }
  0x48   : > { %p937_p4 = pnand %p935_p12, %p1202_p2  ;;  %p942_p1 = por %p941_p13, %p940_p10 }
  0x4a   : > { %p938_p7 = pneg %p937_p4  ;;  %p944_p5 = por %p943_p3, %p942_p1 }
  0x4c   : > { %p945_p6 = pnand %p944_p5, %p938_p7 }
  0x4e   : > { %948 = shalt.err (!%p945_p6)
}
  0x4f   : > { %s949_s5 = scalar_lea.vmem %s1243_s1, 256  ;;  %s1085_s20 = smov [#allocation2]  }
  0x50   : > { %p950_p8 = scmp.ne.s32.totalorder %s1243_s1, %s949_s5  ;;  %s954_s23 = sshll.u32 %s1085_s20, 4  ;;  %s955_s23 = int_to_ptr.vmem [resolvable:$false] %s954_s23 }
  0x51   : > { %s956_s22 = scalar_lea.vmem %s955_s23, 512  ;;  %p957_p4 = scmp.lt.s32.totalorder %s1243_s1, %s955_s23 }
  0x52   : > { %p952_p9 = pnand %p950_p8, %p1202_p2  ;;  %p958_p11 = scmp.lt.s32.totalorder %s956_s22, %s949_s5 }
  0x54   : > { %p953_p12 = pneg %p952_p9  ;;  %p959_p10 = por %p958_p11, %p957_p4 }
  0x56   : > { %p960_p13 = pnand %p959_p10, %p953_p12 }
  0x58   : > { %963 = shalt.err (!%p960_p13)
}
  0x59   : > { %s1460_s19 = smov 4   ;;  %s1461_s6 = smov 64  }
  0x5a   : > { %822 = dma.hbm_to_vmem [thread:$0]  (!%p1182_p0), %s1240_s9, 256, %s1243_s1, %s176_s10, %s1461_s6, %s1461_s6, %s1460_s19  }
  0x5b   : > { %s745_s30 = sshll.u32 %s1076_s16, 7  ;;  %s225_s8 = scalar_lea.vmem [#allocation7], %s744_s7 }
  0x5c   : > { %s234_s5 = sshll.u32 %s225_s8, 4  ;;  %s232_s22 = scalar_lea.hbm %s1432_s2, %s745_s30  ;;  %s235_s5 = int_to_ptr.vmem [resolvable:$true] %s234_s5 }
  0x5d   : > { %s964_s0 = scalar_lea.hbm %s232_s22, 128  ;;  %s969_s17 = scalar_lea.hbm %s1432_s2, 256 }
  0x5e   : > { %p965_p11 = scmp.ne.s32.totalorder %s232_s22, %s964_s0  ;;  %p970_p3 = scmp.lt.u32.totalorder %s232_s22, %s1432_s2 }
  0x5f   : > { %p971_p5 = scmp.lt.u32.totalorder %s969_s17, %s964_s0  ;;  %p973_p8 = scmp.lt.u32.totalorder %s964_s0, %s232_s22 }
  0x60   : > { %p967_p7 = pnand %p965_p11, %p1202_p2 }
  0x61   : > { %p972_p6 = por %p971_p5, %p970_p3 }
  0x62   : > { %p968_p1 = pneg %p967_p7 }
  0x63   : > { %p974_p9 = por %p973_p8, %p972_p6 }
  0x65   : > { %p975_p12 = pnand %p974_p9, %p968_p1 }
  0x67   : > { %978 = shalt.err (!%p975_p12)
}
  0x68   : > { %s979_s28 = scalar_lea.vmem %s235_s5, 128  ;;  %s1086_s9 = smov [#allocation7]  }
  0x69   : > { %p980_p4 = scmp.ne.s32.totalorder %s235_s5, %s979_s28  ;;  %s984_s7 = sshll.u32 %s1086_s9, 4  ;;  %s985_s7 = int_to_ptr.vmem [resolvable:$false] %s984_s7 }
  0x6a   : > { %s986_s14 = scalar_lea.vmem %s985_s7, 256  ;;  %p987_p11 = scmp.lt.s32.totalorder %s235_s5, %s985_s7 }
  0x6b   : > { %p982_p10 = pnand %p980_p4, %p1202_p2  ;;  %p988_p7 = scmp.lt.s32.totalorder %s986_s14, %s979_s28 }
  0x6d   : > { %p983_p13 = pneg %p982_p10  ;;  %p989_p0 = por %p988_p7, %p987_p11 }
  0x6f   : > { %p990_p3 = pnand %p989_p0, %p983_p13 }
  0x71   : > { %993 = shalt.err (!%p990_p3)
}
  0x72   : > { %p1462_p5 = scmp.ne.s32.totalorder %s1455_s29, 0  ;;  %p1463_p1 = scmp.ne.s32.totalorder %s1458_s4, 0 }
  0x73   : > { %s1294_s0 = sand.u32 (!%p1463_p1), 1, %s1064_s13   ;;  %p1464_p2 = scmp.ne.s32.totalorder (!%p1463_p1), %s1450_s24, 0 }
  0x74   : > { %828 = dma.hbm_to_vmem [thread:$0]  (!%p1462_p5), %s232_s22, 128, %s235_s5, %s1196_s11  }
  0x75   : > { %243 = sbr.rel (%p1463_p1) target bundleno = 673 (0x2a1), region = 32  ;;  %s747_s17 = sshll.u32 (!%p1463_p1), %s1294_s0, 4 }
  0x76   : > { %s246_s26 = scalar_lea.sflag (!%p1463_p1), [#allocation3], %s1294_s0  ;;  %s1298_s27 = scalar_lea.vmem (!%p1463_p1), [#allocation2], %s747_s17 }
  0x7c   : > { %1047 = dma.done.wait (%p1464_p2), %s246_s26, 256  }
  0x7d   : > { %1049 = vsyncadd (%p1464_p2), %s246_s26, 4294967040  ;;  %s254_s29 = sand.u32 1, %s1140_s18   ;;  %s748_s11 = sshll.u32 %s1294_s0, 6 }
  0x7e   : > { %s255_s21 = scalar_lea.sflag [#allocation6], %s254_s29  ;;  %s1306_s4 = scalar_lea.vmem [#allocation5], %s748_s11 }
  0x7f   : > { %1051 = dma.done.wait (%p1464_p2), %s255_s21, 1152  }
  0x80   : > { %1053 = vsyncadd (%p1464_p2), %s255_s21, 4294966144  ;;  %vm375_vm0 = vcmask 261120   ;;  %v886_v0 = vld [vmem:[%s1306_s4] sm:$0xff]   ;;  %v887_v1 = vld [vmem:[%s1306_s4 + $0x8] sm:$0xff]   ;;  %s749_s18 = sshll.u32 %s1294_s0, 3  ;;  %v1087_v19 = vmov 0  }
  0x81   : > { %799 = vmatprep.subr.msk.bf16.mxu0 %vm375_vm0, %v886_v0  ;;  %v383_v2 = vsel %vm375_vm0, %v886_v0, 0  ;;  %v888_v3 = vld [vmem:[%s1306_s4 + $0x10] sm:$0xff]   ;;  %v386_v4 = vsel %vm375_vm0, %v887_v1, 0  ;;  %v889_v7 = vld [vmem:[%s1306_s4 + $0x18] sm:$0xff]   ;;  %v890_v9 = vld [vmem:[%s1306_s4 + $0x20] sm:$0xff]   ;;  %s267_s24 = scalar_lea.vmem [#allocation7], %s749_s18 }
  0x82   : > { %780 = vmatpush3.bf16.xpose.msra.mxu0 %v383_v2  ;;  %v894_v5 = vld [vmem:[%s1298_s27] sm:$0xff]   ;;  %v389_v6 = vsel %vm375_vm0, %v888_v3, 0  ;;  %v392_v8 = vsel %vm375_vm0, %v889_v7, 0  ;;  %v395_v10 = vsel %vm375_vm0, %v890_v9, 0  ;;  %v891_v11 = vld [vmem:[%s1306_s4 + $0x28] sm:$0xff]   ;;  %v893_v15 = vld [vmem:[%s1306_s4 + $0x38] sm:$0xff]  }
  0x83   : > { %800 = vmatprep.subr.msk.bf16.mxu0 %vm375_vm0, %v887_v1  ;;  %795 = vmatprep.mubr.msk.bf16.mxu0 %vm375_vm0, %v894_v5  ;;  %v398_v12 = vsel %vm375_vm0, %v891_v11, 0  ;;  %v892_v13 = vld [vmem:[%s1306_s4 + $0x30] sm:$0xff]   ;;  %v404_v16 = vsel %vm375_vm0, %v893_v15, 0  ;;  %v895_v17 = vld [vmem:[%s1298_s27 + $0x8] sm:$0xff]   ;;  %v459_v18 = vld [vmem:[%s267_s24] sm:$0xff]  ;;  %s764_s10 = sshll.u32 %s1072_s15, 7 }
  0x84   : > { %v401_v14 = vsel %vm375_vm0, %v892_v13, 0  ;;  %vm460_vm1 = vnez %v459_v18  ;;  %s299_s6 = scalar_lea.vmem [#allocation8], %s749_s18  ;;  %s1381_s23 = scalar_lea.hbm %s1433_s3, %s764_s10 }
  0x85   : > { %v465_v20 = vsel %vm460_vm1, 16843009, %v1087_v19  ;;  %s600_s30 = sshll.u32 %s299_s6, 4  ;;  %s585_s15 = scalar_lea.sflag [#allocation4], %s1294_s0  ;;  %s1383_s30 = int_to_ptr.vmem [resolvable:$true] %s600_s30 }
  0x86   : > { %v468_v21 = vunpack.c.2.s8 %v465_v20  ;;  %v466_v22 = vunpack.c.0.s8 %v465_v20  ;;  %v469_v23 = vunpack.c.3.s8 %v465_v20  ;;  %v467_v24 = vunpack.c.1.s8 %v465_v20  ;;  %s994_s22 = scalar_lea.vmem %s1383_s30, 128  ;;  %p1473_p6 = scmp.ne.s32.totalorder %s1451_s25, 0 }
  0x87   : > { %p995_p0 = scmp.ne.s32.totalorder %s1383_s30, %s994_s22  ;;  %s1088_s1 = smov [#allocation8]  }
  0x88   : > { %v474_v25 = vpack.c.b16 %v468_v21, %v468_v21  ;;  %v470_v26 = vpack.c.b16 %v466_v22, %v466_v22  ;;  %v476_v27 = vpack.c.b16 %v469_v23, %v469_v23  ;;  %v472_v28 = vpack.c.b16 %v467_v24, %v467_v24  ;;  %s998_s28 = sshll.u32 %s1088_s1, 4  ;;  %s999_s28 = int_to_ptr.vmem [resolvable:$false] %s998_s28 }
  0x89   : > { %p996_p8 = pnand %p995_p0, %p1473_p6  ;;  %s1000_s9 = scalar_lea.vmem %s999_s28, 256 }
  0x8a   : > { %782 = vmatpush3.bf16.xpose.msra.mxu0 %v386_v4  ;;  %v475_v29 = vpack.c.b8 %v474_v25, %v474_v25  ;;  %v471_v30 = vpack.c.b8 %v470_v26, %v470_v26  ;;  %v477_v31 = vpack.c.b8 %v476_v27, %v476_v27  ;;  %v473_v33 = vpack.c.b8 %v472_v28, %v472_v28  ;;  %p1001_p12 = scmp.lt.s32.totalorder %s1383_s30, %s999_s28  ;;  %p1002_p4 = scmp.lt.s32.totalorder %s1000_s9, %s994_s22 }
  0x8b   : > { %801 = vmatprep.subr.msk.bf16.mxu0 %vm375_vm0, %v888_v3  ;;  %p997_p9 = pneg %p996_p8 }
  0x8c   : > { %vm480_vm2 = vnez %v475_v29  ;;  %vm478_vm3 = vnez %v471_v30  ;;  %vm481_vm4 = vnez %v477_v31  ;;  %vm479_vm5 = vnez %v473_v33  ;;  %p1003_p10 = por %p1002_p4, %p1001_p12 }
  0x8d   : > { %v484_v37 = vsel %vm480_vm2, 16843009, %v1087_v19  ;;  %v482_v38 = vsel %vm478_vm3, 16843009, %v1087_v19  ;;  %v485_v39 = vsel %vm481_vm4, 16843009, %v1087_v19 }
  0x8e   : > { %v483_v40 = vsel %vm479_vm5, 16843009, %v1087_v19  ;;  %v488_v41 = vunpack.c.0.s8 %v484_v37  ;;  %v486_v42 = vunpack.c.0.s8 %v482_v38  ;;  %v489_v43 = vunpack.c.0.s8 %v485_v39  ;;  %p1004_p13 = pnand %p1003_p10, %p997_p9 }
  0x8f   : > { %v487_v44 = vunpack.c.0.s8 %v483_v40 }
  0x90   : > { %vm1343_vm6 = vcmp.ne.s32.totalorder %v488_v41, 0  ;;  %vm1347_vm7 = vcmp.ne.s32.totalorder %v486_v42, 0  ;;  %vm1351_vm8 = vcmp.ne.s32.totalorder %v489_v43, 0 }
  0x91   : > { %vm1355_vm9 = vcmp.ne.s32.totalorder %v487_v44, 0 }
  0x92   : > { %784 = vmatpush3.bf16.xpose.msra.mxu0 %v389_v6 }
  0x93   : > { %802 = vmatprep.subr.msk.bf16.mxu0 %vm375_vm0, %v889_v7 }
  0x9a   : > { %786 = vmatpush3.bf16.xpose.msra.mxu0 %v392_v8 }
  0x9b   : > { %803 = vmatprep.subr.msk.bf16.mxu0 %vm375_vm0, %v890_v9 }
  0xa2   : > { %788 = vmatpush3.bf16.xpose.msra.mxu0 %v395_v10 }
  0xa3   : > { %804 = vmatprep.subr.msk.bf16.mxu0 %vm375_vm0, %v891_v11 }
  0xaa   : > { %790 = vmatpush3.bf16.xpose.msra.mxu0 %v398_v12 }
  0xab   : > { %805 = vmatprep.subr.msk.bf16.mxu0 %vm375_vm0, %v892_v13 }
  0xb2   : > { %792 = vmatpush3.bf16.xpose.msra.mxu0 %v401_v14 }
  0xb3   : > { %806 = vmatprep.subr.msk.bf16.mxu0 %vm375_vm0, %v893_v15 }
  0xba   : > { %794 = vmatpush3.bf16.xpose.msra.mxu0 %v404_v16 }
  0xc1   : > { %796 = vmatmul.mubr.msk.bf16.vlgmr.msra.gmra.mrb[0].mxu0 %vm375_vm0, %v895_v17 }
 0x194   : > { %v797_v32 = vpop.f32.mrb[0].mxu0 }
 0x195   : > { %896 = vtanh.f32 %v797_v32  ;;  %v440_v34 = vpop.f32.mrb[1].mxu0 }
 0x196   : > { %898 = vtanh.f32 %v440_v34  ;;  %v798_v35 = vpop.f32.mrb[2].mxu0 }
 0x197   : > { %900 = vtanh.f32 %v798_v35  ;;  %v443_v36 = vpop.f32.mrb[3].mxu0 }
 0x198   : > { %902 = vtanh.f32 %v443_v36 }
 0x19f   : > { %v897_v45 = vpop.eup %896 }
 0x1a0   : > { %v899_v47 = vpop.eup %898  ;;  %v463_v48 = vsub.f32 0.0, %v897_v45 }
 0x1a1   : > { %v901_v50 = vpop.eup %900  ;;  %v461_v51 = vsub.f32 0.0, %v899_v47 }
 0x1a2   : > { %v903_v53 = vpop.eup %902  ;;  %v464_v54 = vsub.f32 0.0, %v901_v50  ;;  %v496_v56 = vsel %vm1343_vm6, %v463_v48, %v897_v45 }
 0x1a3   : > { %v462_v57 = vsub.f32 0.0, %v903_v53  ;;  %v494_v58 = vsel %vm1347_vm7, %v461_v51, %v899_v47  ;;  %v500_v59 = vmul.f32 %v496_v56, %v496_v56  ;;  %v504_v32 = vmul.f32 0.5, %v496_v56 }
 0x1a4   : > { %v497_v60 = vsel %vm1351_vm8, %v464_v54, %v901_v50  ;;  %v498_v61 = vmul.f32 %v494_v58, %v494_v58  ;;  %v502_v28 = vmul.f32 0.5, %v494_v58 }
 0x1a5   : > { %v495_v62 = vsel %vm1355_vm9, %v462_v57, %v903_v53  ;;  %v501_v63 = vmul.f32 %v497_v60, %v497_v60  ;;  %v508_v0 = vmul.f32 -2.6351687e-05, %v500_v59  ;;  %v505_v37 = vmul.f32 0.5, %v497_v60 }
 0x1a6   : > { %v499_v1 = vmul.f32 %v495_v62, %v495_v62  ;;  %v506_v2 = vmul.f32 -2.6351687e-05, %v498_v61  ;;  %v503_v33 = vmul.f32 0.5, %v495_v62 }
 0x1a7   : > { %v509_v3 = vmul.f32 -2.6351687e-05, %v501_v63  ;;  %v512_v4 = vadd.f32 0.00034722223, %v508_v0 }
 0x1a8   : > { %v507_v5 = vmul.f32 -2.6351687e-05, %v499_v1  ;;  %v510_v6 = vadd.f32 0.00034722223, %v506_v2 }
 0x1a9   : > { %v513_v7 = vadd.f32 0.00034722223, %v509_v3  ;;  %v516_v8 = vmul.f32 %v512_v4, %v500_v59 }
 0x1aa   : > { %v511_v9 = vadd.f32 0.00034722223, %v507_v5  ;;  %v514_v10 = vmul.f32 %v510_v6, %v498_v61 }
 0x1ab   : > { %v517_v11 = vmul.f32 %v513_v7, %v501_v63  ;;  %v520_v12 = vadd.f32 -0.0052083335, %v516_v8 }
 0x1ac   : > { %v515_v13 = vmul.f32 %v511_v9, %v499_v1  ;;  %v518_v14 = vadd.f32 -0.0052083335, %v514_v10 }
 0x1ad   : > { %v521_v15 = vadd.f32 -0.0052083335, %v517_v11  ;;  %v524_v16 = vmul.f32 %v520_v12, %v500_v59 }
 0x1ae   : > { %v519_v17 = vadd.f32 -0.0052083335, %v515_v13  ;;  %v522_v18 = vmul.f32 %v518_v14, %v498_v61 }
 0x1af   : > { %v525_v19 = vmul.f32 %v521_v15, %v501_v63  ;;  %v528_v20 = vadd.f32 0.125, %v524_v16 }
 0x1b0   : > { %v523_v21 = vmul.f32 %v519_v17, %v499_v1  ;;  %v526_v22 = vadd.f32 0.125, %v522_v18 }
 0x1b1   : > { %v529_v23 = vadd.f32 0.125, %v525_v19  ;;  %v532_v24 = vmul.f32 %v528_v20, %v500_v59 }
 0x1b2   : > { %v527_v25 = vadd.f32 0.125, %v523_v21  ;;  %v530_v26 = vmul.f32 %v526_v22, %v498_v61 }
 0x1b3   : > { %v533_v27 = vmul.f32 %v529_v23, %v501_v63  ;;  %v536_v31 = vadd.f32 0.6931472, %v532_v24 }
 0x1b4   : > { %v531_v29 = vmul.f32 %v527_v25, %v499_v1  ;;  %v534_v30 = vadd.f32 0.6931472, %v530_v26  ;;  %v570_v1 = vlaneseq }
 0x1b5   : > { %v537_v35 = vadd.f32 0.6931472, %v533_v27  ;;  %v540_v39 = vadd.f32 %v536_v31, %v504_v32 }
 0x1b6   : > { %v535_v34 = vadd.f32 0.6931472, %v531_v29  ;;  %v538_v36 = vadd.f32 %v534_v30, %v502_v28  ;;  %v571_v2 = vand.u32 127, %v570_v1  ;;  %v573_v3 = vshrl.u32 %v570_v1, 7 }
 0x1b7   : > { %v541_v40 = vadd.f32 %v537_v35, %v505_v37  ;;  %v556_v47 = vsel %vm1343_vm6, %v540_v39, 0.0 }
 0x1b8   : > { %v539_v38 = vadd.f32 %v535_v34, %v503_v33  ;;  %v554_v42 = vsel %vm1347_vm7, %v538_v36, 0.0  ;;  %vm574_vm10 = vcmp.eq.s32.totalorder %v573_v3, 0  ;;  %vm577_vm11 = vcmp.eq.s32.totalorder %v571_v2, 1 }
 0x1b9   : > { %v557_v51 = vsel %vm1351_vm8, %v541_v40, 0.0  ;;  %vm575_vm12 = vcmp.eq.s32.totalorder %v571_v2, 0  ;;  %vm578_vm13 = vmand %vm574_vm10, %vm577_vm11 }
 0x1ba   : > { %v542_v41 = vadd.f32 %v539_v38, %v538_v36  ;;  %v555_v43 = vsel %vm1355_vm9, %v539_v38, 0.0  ;;  %vm576_vm14 = vmand %vm574_vm10, %vm575_vm12 }
 0x1bb   : > { %v558_v44 = vadd.f32 %v555_v43, %v554_v42 }
 0x1bc   : > { %v543_v45 = vadd.f32 %v542_v41, %v540_v39 }
 0x1bd   : > { %v559_v48 = vadd.f32 %v558_v44, %v556_v47 }
 0x1be   : > { %v544_v50 = vadd.f32 %v543_v45, %v541_v40 }
 0x1bf   : > { %v560_v53 = vadd.f32 %v559_v48, %v557_v51 }
 0x1c0   : > { %545 = vadd.xlane.f32.xlu0 %v544_v50 }
 0x1c4   : > { %561 = vadd.xlane.f32.xlu0 %v560_v53 }
 0x24d   : > { %v546_v54 = vpop.xlane.xlu0 %545 }
 0x24e   : > { %v547_v56 = vrot.slane %v546_v54, 4 }
 0x250   : > { %v548_v49 = vadd.f32 %v547_v56, %v546_v54 }
 0x251   : > { %v562_v57 = vpop.xlane.xlu0 %561 }
 0x252   : > { %v549_v58 = vrot.slane %v548_v49, 2  ;;  %v563_v55 = vrot.slane %v562_v57, 4 }
 0x254   : > { %v564_v59 = vadd.f32 %v563_v55, %v562_v57  ;;  %v550_v60 = vadd.f32 %v549_v58, %v548_v49 }
 0x256   : > { %v565_v61 = vrot.slane %v564_v59, 2  ;;  %v551_v46 = vrot.slane %v550_v60, 1 }
 0x258   : > { %v566_v62 = vadd.f32 %v565_v61, %v564_v59  ;;  %v552_v63 = vadd.f32 %v551_v46, %v550_v60 }
 0x25a   : > { %807 = vpush %v552_v63  ;;  %v567_v52 = vrot.slane %v566_v62, 1 }
 0x25c   : > { %v568_v0 = vadd.f32 %v567_v52, %v566_v62 }
 0x25e   : > { %809 = vpush %v568_v0 }
 0x28b   : > { %s808_s19 = spop %807 }
 0x28c   : > { %v581_v5 = vstv %s808_s19 }
 0x28f   : > { %s810_s8 = spop %809 }
 0x290   : > { %v579_v4 = vstv %s810_s8 }
 0x291   : > { %v580_v6 = vsel %vm578_vm13, %v579_v4, 0.0 }
 0x292   : > { %v582_v7 = vsel %vm576_vm14, %v581_v5, %v580_v6 }
 0x293   : > { %583 = vst [vmem:[%s299_s6] sm:$0xff] %v582_v7 }
 0x294   : > { %1007 = shalt.err (!%p1004_p13)
}
 0x295   : > { %s1008_s7 = scalar_lea.hbm %s1381_s23, 128  ;;  %s1012_s17 = scalar_lea.hbm %s1433_s3, 256 }
 0x296   : > { %p1009_p11 = scmp.ne.s32.totalorder %s1381_s23, %s1008_s7  ;;  %p1013_p5 = scmp.lt.u32.totalorder %s1381_s23, %s1433_s3 }
 0x297   : > { %p1014_p1 = scmp.lt.u32.totalorder %s1012_s17, %s1008_s7  ;;  %p1016_p0 = scmp.lt.u32.totalorder %s1008_s7, %s1381_s23 }
 0x298   : > { %p1010_p7 = pnand %p1009_p11, %p1473_p6 }
 0x299   : > { %p1015_p2 = por %p1014_p1, %p1013_p5 }
 0x29a   : > { %p1011_p3 = pneg %p1010_p7 }
 0x29b   : > { %p1017_p8 = por %p1016_p0, %p1015_p2 }
 0x29d   : > { %p1018_p9 = pnand %p1017_p8, %p1011_p3 }
 0x29f   : > { %1021 = shalt.err (!%p1018_p9)
}
 0x2a0   : > { %817 = dma.vmem_to_hbm [thread:$0]  (%p1473_p6), %s1383_s30, 128, %s1381_s23, %s585_s15  }
 0x2a1 PF: > { %s1474_s29 = sld [smem:[#allocation16_spill]]  ;;  %s1475_s11 = sld [smem:[#allocation13_spill]] }
 0x2a2   : > { %s612_s21 = sand.u32 1, %s1060_s12  }
 0x2a3   : > { %s613_s4 = scalar_lea.sflag [#allocation4], %s612_s21 }
 0x2a7   : > { %p1476_p12 = scmp.ne.s32.totalorder %s1474_s29, 0  ;;  %p1477_p4 = scmp.ge.s32.totalorder %s1475_s11, 2 }
 0x2a9   : > { %p830_p10 = pnand %p1477_p4, %p1476_p12 }
 0x2ab   : > { %1055 = dma.done.wait (!%p830_p10), %s613_s4, 128  }
 0x2ac   : > { %1057 = vsyncadd (!%p830_p10), %s613_s4, 4294967168  ;;  %s22_s17 = sadd.s32 1, %s1475_s11   ;;  %s1478_s18 = sld [smem:[#allocation12_spill]] }
 0x2ad   : > { %p19_p13 = scmp.ge.s32.totalorder %s22_s17, 4   ;;  %s1479_s14 = sld [smem:[#allocation15_spill]] }
 0x2ae   : > { %s1480_s25 = sld [smem:[#allocation14_spill]]  ;;  %s1481_s12 = smov %s1064_s13 }
 0x2af   : > { %s1483_s15 = smov %s1076_s16  ;;  %21 = sbr.rel (!%p19_p13) target bundleno = 11 (0xb), region = 101 }
 0x2b2   : > { %s1482_s13 = smov %s1478_s18 }
 0x2b4   : > { %s1484_s16 = smov %s1480_s25 }
 0x2b6   :  { %618 = vsyncpa [#allocation3], 1 }
 0x2b7   :  { %620 = vsyncpa [#allocation3 + $0x1], 1 }
 0x2b8   :  { %621 = vsyncpa [#allocation6], 1 }
 0x2b9   :  { %623 = vsyncpa [#allocation6 + $0x1], 1 }
 0x2ba   :  { %624 = vsyncpa [#allocation4], 1 }
 0x2bb   :  { %626 = vsyncpa [#allocation4 + $0x1], 1 }

</bundles_post_ra>
